<compile_context>
chip_gen: v7x
topology: tpu7x:2x2x1
jax: 0.10.0
libtpu: 0.0.40
codegen_flags: <defaults>
</compile_context>

<pallas_src>
import functools

import jax
import jax.numpy as jnp
from jax.experimental import pallas as pl
from jax.experimental.pallas import tpu as pltpu


def _actor_kernel(x_ref, w1_ref, b1_ref, w2_ref, b2_ref, w3_ref, b3_ref, o_ref):
    # x_ref: (TB, state_dim) batch-major row tile.
    # w*_ref: PyTorch layout (out_features, in_features); b*_ref: (out_features, 1).
    # o_ref: (action_dim, TB) -- batch on the 128-lane axis.
    x_t = x_ref[...].T                                              # (state_dim, TB)

    h1 = jnp.dot(w1_ref[...], x_t, preferred_element_type=jnp.float32)
    h1 = jnp.maximum(h1 + b1_ref[...], 0.0)                         # (64, TB)

    h2 = jnp.dot(w2_ref[...], h1, preferred_element_type=jnp.float32)
    h2 = jnp.maximum(h2 + b2_ref[...], 0.0)                         # (64, TB)

    h3 = jnp.dot(w3_ref[...], h2, preferred_element_type=jnp.float32)
    o_ref[...] = jnp.tanh(h3 + b3_ref[...]).astype(o_ref.dtype)     # (action_dim, TB)


def _round_up(n: int, m: int) -> int:
    return ((n + m - 1) // m) * m


@functools.partial(jax.jit, static_argnames=("block_rows",))
def actor_forward(x, w1, b1, w2, b2, w3, b3, *, block_rows=2048):
    B, state_dim = x.shape
    action_dim = w3.shape[0]
    assert block_rows >= 128 and block_rows % 128 == 0

    if B <= min(256, block_rows):
        # Single full-extent block: always legal regardless of B.
        TB = B
    else:
        # Lane-aligned tiles (multiple of 128 for the transposed output) and
        # at least two grid steps so the batch axis can split across the two
        # v7x TensorCores.  Trailing partial block handled by Pallas.
        TB = min(block_rows, _round_up(pl.cdiv(B, 2), 128))
    grid = (pl.cdiv(B, TB),)

    # Weights / biases: same block index every step -> VMEM-resident, no re-DMA.
    resident = lambda arr: pl.BlockSpec(arr.shape, lambda i: (0, 0))

    out_t = pl.pallas_call(
        _actor_kernel,
        out_shape=jax.ShapeDtypeStruct((action_dim, B), x.dtype),
        grid=grid,
        in_specs=[
            pl.BlockSpec((TB, state_dim), lambda i: (i, 0)),
            resident(w1), resident(b1),
            resident(w2), resident(b2),
            resident(w3), resident(b3),
        ],
        out_specs=pl.BlockSpec((action_dim, TB), lambda i: (0, i)),
        compiler_params=pltpu.CompilerParams(
            dimension_semantics=("parallel",)),
    )(x, w1, b1, w2, b2, w3, b3)

    # Tiny (action_dim, B) -> (B, action_dim) flip; cheap XLA transpose.
    return out_t.T


def init_actor_params(key, state_dim, action_dim, hidden=64):
    """PyTorch-layout params: W (out_features, in_features), b (out_features, 1),
    init ~ U[-1/sqrt(fan_in), 1/sqrt(fan_in)] like nn.Linear defaults."""
    def linear(key, fan_in, fan_out):
        kw, kb = jax.random.split(key)
        bound = 1.0 / (fan_in ** 0.5)
        w = jax.random.uniform(kw, (fan_out, fan_in), jnp.float32, -bound, bound)
        b = jax.random.uniform(kb, (fan_out, 1), jnp.float32, -bound, bound)
        return w, b

    k1, k2, k3 = jax.random.split(key, 3)
    w1, b1 = linear(k1, state_dim, hidden)
    w2, b2 = linear(k2, hidden, hidden)
    w3, b3 = linear(k3, hidden, action_dim)
    return w1, b1, w2, b2, w3, b3


def actor_ref(x, w1, b1, w2, b2, w3, b3):
    h1 = jnp.maximum(x @ w1.T + b1.T, 0.0)
    h2 = jnp.maximum(h1 @ w2.T + b2.T, 0.0)
    return jnp.tanh(h2 @ w3.T + b3.T)


if __name__ == "__main__":
    key = jax.random.PRNGKey(0)
    k_x, k_x2, k_p = jax.random.split(key, 3)

    state_dim, action_dim = 16, 4
    params = init_actor_params(k_p, state_dim, action_dim)

    # 1) Tiny single-tile case (typical DDPG inference shape).
    x = jax.random.normal(k_x, (2, state_dim), jnp.float32)
    out = jax.block_until_ready(actor_forward(x, *params))
    exp = actor_ref(x, *params)
    assert out.shape == (2, action_dim)
    assert jnp.allclose(out, exp, atol=1e-5, rtol=1e-5), (
        f"max abs err {jnp.max(jnp.abs(out - exp))}")

    # 2) Tiled path with a partial trailing block (grid=(3,), last block = 44 rows).
    x2 = jax.random.normal(k_x2, (300, state_dim), jnp.float32)
    out2 = jax.block_until_ready(actor_forward(x2, *params, block_rows=128))
    exp2 = actor_ref(x2, *params)
    assert out2.shape == (300, action_dim)
    assert jnp.allclose(out2, exp2, atol=1e-5, rtol=1e-5), (
        f"max abs err {jnp.max(jnp.abs(out2 - exp2))}")

    # 3) bf16 activations/weights end-to-end (f32 MXU accumulation in-kernel).
    params_bf16 = tuple(p.astype(jnp.bfloat16) for p in params)
    x3 = x2.astype(jnp.bfloat16)
    out3 = jax.block_until_ready(actor_forward(x3, *params_bf16, block_rows=128))
    exp3 = actor_ref(x3.astype(jnp.float32),
                     *(p.astype(jnp.float32) for p in params_bf16))
    assert jnp.allclose(out3.astype(jnp.float32), exp3, atol=2e-2, rtol=2e-2), (
        f"max abs err {jnp.max(jnp.abs(out3.astype(jnp.float32) - exp3))}")

    print("KERNEL_OK")
</pallas_src>

<mosaic_0001>
module attributes {stable_mosaic.version = 11 : i64} {
  func.func @_actor_kernel(%arg0: i32, %arg1: memref<2x16xf32, #tpu.memory_space<vmem>>, %arg2: memref<64x16xf32, #tpu.memory_space<vmem>>, %arg3: memref<64x1xf32, #tpu.memory_space<vmem>>, %arg4: memref<64x64xf32, #tpu.memory_space<vmem>>, %arg5: memref<64x1xf32, #tpu.memory_space<vmem>>, %arg6: memref<4x64xf32, #tpu.memory_space<vmem>>, %arg7: memref<4x1xf32, #tpu.memory_space<vmem>>, %arg8: memref<4x2xf32, #tpu.memory_space<vmem>>) attributes {dimension_semantics = [#tpu.dimension_semantics<parallel>], iteration_bounds = array<i64: 1>, scalar_prefetch = 0 : i64, scratch_operands = 0 : i64, tpu.core_type = #tpu.core_type<tc>, window_params = [{transform_indices = @transform_0, window_bounds = array<i64: 2, 16>}, {pipeline_mode = #tpu.pipeline_mode<synchronous>, transform_indices = @transform_1, window_bounds = array<i64: 64, 16>}, {pipeline_mode = #tpu.pipeline_mode<synchronous>, transform_indices = @transform_2, window_bounds = array<i64: 64, 1>}, {pipeline_mode = #tpu.pipeline_mode<synchronous>, transform_indices = @transform_3, window_bounds = array<i64: 64, 64>}, {pipeline_mode = #tpu.pipeline_mode<synchronous>, transform_indices = @transform_4, window_bounds = array<i64: 64, 1>}, {pipeline_mode = #tpu.pipeline_mode<synchronous>, transform_indices = @transform_5, window_bounds = array<i64: 4, 64>}, {pipeline_mode = #tpu.pipeline_mode<synchronous>, transform_indices = @transform_6, window_bounds = array<i64: 4, 1>}, {transform_indices = @transform_7, window_bounds = array<i64: 4, 2>}]} {
    %c0 = arith.constant 0 : index
    %c0_0 = arith.constant 0 : index
    %0 = vector.load %arg1[%c0, %c0_0] : memref<2x16xf32, #tpu.memory_space<vmem>>, vector<2x16xf32>
    %1 = tpu.transpose %0, [1, 0] : vector<2x16xf32> -> vector<16x2xf32>
    %c0_1 = arith.constant 0 : index
    %c0_2 = arith.constant 0 : index
    %2 = vector.load %arg2[%c0_1, %c0_2] : memref<64x16xf32, #tpu.memory_space<vmem>>, vector<64x16xf32>
    %cst = arith.constant dense<0.000000e+00> : vector<64x2xf32>
    %3 = tpu.matmul %2, %1, %cst {dimension_numbers = #tpu.dot_dimension_numbers<[1], [0], [0], [1], [0, 0, 1, 1], [], []>} : vector<64x16xf32>, vector<16x2xf32>, vector<64x2xf32> -> vector<64x2xf32>
    %c0_3 = arith.constant 0 : index
    %c0_4 = arith.constant 0 : index
    %4 = vector.load %arg3[%c0_3, %c0_4] : memref<64x1xf32, #tpu.memory_space<vmem>>, vector<64x1xf32>
    %5 = vector.broadcast %4 : vector<64x1xf32> to vector<64x2xf32>
    %6 = arith.addf %3, %5 : vector<64x2xf32>
    %cst_5 = arith.constant 0.000000e+00 : f32
    %7 = vector.broadcast %cst_5 : f32 to vector<64x2xf32>
    %8 = arith.maximumf %6, %7 : vector<64x2xf32>
    %c0_6 = arith.constant 0 : index
    %c0_7 = arith.constant 0 : index
    %9 = vector.load %arg4[%c0_6, %c0_7] : memref<64x64xf32, #tpu.memory_space<vmem>>, vector<64x64xf32>
    %cst_8 = arith.constant dense<0.000000e+00> : vector<64x2xf32>
    %10 = tpu.matmul %9, %8, %cst_8 {dimension_numbers = #tpu.dot_dimension_numbers<[1], [0], [0], [1], [0, 0, 1, 1], [], []>} : vector<64x64xf32>, vector<64x2xf32>, vector<64x2xf32> -> vector<64x2xf32>
    %c0_9 = arith.constant 0 : index
    %c0_10 = arith.constant 0 : index
    %11 = vector.load %arg5[%c0_9, %c0_10] : memref<64x1xf32, #tpu.memory_space<vmem>>, vector<64x1xf32>
    %12 = vector.broadcast %11 : vector<64x1xf32> to vector<64x2xf32>
    %13 = arith.addf %10, %12 : vector<64x2xf32>
    %cst_11 = arith.constant 0.000000e+00 : f32
    %14 = vector.broadcast %cst_11 : f32 to vector<64x2xf32>
    %15 = arith.maximumf %13, %14 : vector<64x2xf32>
    %c0_12 = arith.constant 0 : index
    %c0_13 = arith.constant 0 : index
    %16 = vector.load %arg6[%c0_12, %c0_13] : memref<4x64xf32, #tpu.memory_space<vmem>>, vector<4x64xf32>
    %cst_14 = arith.constant dense<0.000000e+00> : vector<4x2xf32>
    %17 = tpu.matmul %16, %15, %cst_14 {dimension_numbers = #tpu.dot_dimension_numbers<[1], [0], [0], [1], [0, 0, 1, 1], [], []>} : vector<4x64xf32>, vector<64x2xf32>, vector<4x2xf32> -> vector<4x2xf32>
    %c0_15 = arith.constant 0 : index
    %c0_16 = arith.constant 0 : index
    %18 = vector.load %arg7[%c0_15, %c0_16] : memref<4x1xf32, #tpu.memory_space<vmem>>, vector<4x1xf32>
    %19 = vector.broadcast %18 : vector<4x1xf32> to vector<4x2xf32>
    %20 = arith.addf %17, %19 : vector<4x2xf32>
    %21 = math.tanh %20 : vector<4x2xf32>
    %c0_17 = arith.constant 0 : index
    %c0_18 = arith.constant 0 : index
    %22 = vector.load %arg8[%c0_17, %c0_18] : memref<4x2xf32, #tpu.memory_space<vmem>>, vector<4x2xf32>
    tpu.vector_store %arg8[%c0_17, %c0_18], %21 {strides = array<i32>} : memref<4x2xf32, #tpu.memory_space<vmem>>, vector<4x2xf32>,
    return
  }
  func.func @transform_0(%arg0: i32) -> (i32, i32) {
    %c0_i32 = arith.constant 0 : i32
    %c0_i32_0 = arith.constant 0 : i32
    return %arg0, %c0_i32 : i32, i32
  }
  func.func @transform_1(%arg0: i32) -> (i32, i32) {
    %c0_i32 = arith.constant 0 : i32
    %c0_i32_0 = arith.constant 0 : i32
    %c0_i32_1 = arith.constant 0 : i32
    return %c0_i32, %c0_i32_0 : i32, i32
  }
  func.func @transform_2(%arg0: i32) -> (i32, i32) {
    %c0_i32 = arith.constant 0 : i32
    %c0_i32_0 = arith.constant 0 : i32
    %c0_i32_1 = arith.constant 0 : i32
    return %c0_i32, %c0_i32_0 : i32, i32
  }
  func.func @transform_3(%arg0: i32) -> (i32, i32) {
    %c0_i32 = arith.constant 0 : i32
    %c0_i32_0 = arith.constant 0 : i32
    %c0_i32_1 = arith.constant 0 : i32
    return %c0_i32, %c0_i32_0 : i32, i32
  }
  func.func @transform_4(%arg0: i32) -> (i32, i32) {
    %c0_i32 = arith.constant 0 : i32
    %c0_i32_0 = arith.constant 0 : i32
    %c0_i32_1 = arith.constant 0 : i32
    return %c0_i32, %c0_i32_0 : i32, i32
  }
  func.func @transform_5(%arg0: i32) -> (i32, i32) {
    %c0_i32 = arith.constant 0 : i32
    %c0_i32_0 = arith.constant 0 : i32
    %c0_i32_1 = arith.constant 0 : i32
    return %c0_i32, %c0_i32_0 : i32, i32
  }
  func.func @transform_6(%arg0: i32) -> (i32, i32) {
    %c0_i32 = arith.constant 0 : i32
    %c0_i32_0 = arith.constant 0 : i32
    %c0_i32_1 = arith.constant 0 : i32
    return %c0_i32, %c0_i32_0 : i32, i32
  }
  func.func @transform_7(%arg0: i32) -> (i32, i32) {
    %c0_i32 = arith.constant 0 : i32
    %c0_i32_0 = arith.constant 0 : i32
    return %c0_i32, %arg0 : i32, i32
  }
}

</mosaic_0001>

<bundles_post_ra>
// kernel: actor_forward.1
= control target key start
LH: loop header
LB: loop body
LE: loop exit
PB: predicated region body
PF: predicated region fallthrough
CT: control target
= control target key end

     0   :  { %vm83_vm0 = vcmask 130048   ;;  %v654_v2 = vmov 0   ;;  %vm280_vm1 = vcmask 523264   ;;  %vm656_vm2 = vmmov 0   ;;  %s825_s0 = inlined_call_operand.vmem [shape: f32[2,16], index: 0, kind: input, shape index: {}]   ;;  %s826_s1 = inlined_call_operand.vmem [shape: f32[64,16], index: 1, kind: input, shape index: {}]   ;;  %s827_s2 = inlined_call_operand.vmem [shape: f32[64,1], index: 2, kind: input, shape index: {}]   ;;  %s828_s4 = inlined_call_operand.vmem [shape: f32[64,1], index: 4, kind: input, shape index: {}]   ;;  %s829_s6 = inlined_call_operand.vmem [shape: f32[4,1], index: 6, kind: input, shape index: {}]   ;;  %s830_s3 = inlined_call_operand.vmem [shape: f32[64,64], index: 3, kind: input, shape index: {}]   ;;  %s831_s5 = inlined_call_operand.vmem [shape: f32[4,64], index: 5, kind: input, shape index: {}]   ;;  %s832_s7 = inlined_call_operand.vmem [shape: f32[4,2], index: 7, kind: output, shape index: {}]  }
   0x1   :  { %v26_v0 = vld [vmem:[%s825_s0] sm:$0x3]  ;;  %650 = vset.pattern.permute.xlu0 %v654_v2  ;;  %651 = vset.pattern.permute.xlu1 %v654_v2  ;;  %v28_v3 = vld [vmem:[%s826_s1 + $0x8] sm:$0xff]  ;;  %v29_v4 = vld [vmem:[%s826_s1 + $0x10] sm:$0xff]  ;;  %vm499_vm3 = vcmask 11264  }
   0x2   :  { %v27_v1 = vld [vmem:[%s826_s1] sm:$0xff]  ;;  %557 = vmatprep.subr.msk.mxu0 %vm83_vm0, %v26_v0  ;;  %v37_v6 = vld [vmem:[%s827_s2 + $0x10] sm:$0xff]  ;;  %v36_v7 = vld [vmem:[%s827_s2 + $0x8] sm:$0xff] }
   0x3   :  { %559 = vmatprep.mubr.msk.f32.mxu0 %vm83_vm0, %v27_v1  ;;  %558 = vmatpush3.xpose.msk.msra.mxu0 %vm83_vm0, %v26_v0  ;;  %v35_v5 = vld [vmem:[%s827_s2] sm:$0xff]  ;;  %v38_v8 = vld [vmem:[%s827_s2 + $0x18] sm:$0xff]  ;;  %v40_v12 = vld [vmem:[%s827_s2 + $0x28] sm:$0xff] }
   0x4   :  { %45 = vperm.xlu0 %650, %v35_v5   ;;  %55 = vperm.xlu1 %651, %v37_v6   ;;  %v30_v9 = vld [vmem:[%s826_s1 + $0x18] sm:$0xff]  ;;  %v31_v10 = vld [vmem:[%s826_s1 + $0x20] sm:$0xff]  ;;  %v32_v13 = vld [vmem:[%s826_s1 + $0x28] sm:$0xff] }
   0x5   :  { %v39_v11 = vld [vmem:[%s827_s2 + $0x20] sm:$0xff]  ;;  %v33_v14 = vld [vmem:[%s826_s1 + $0x30] sm:$0xff]  ;;  %v42_v16 = vld [vmem:[%s827_s2 + $0x38] sm:$0xff] }
   0x6   :  { %560 = vmatmul.mubr.msk.f32.vlgmr.msra.gmra.mrb[0].mxu0 %vm83_vm0, %v28_v3  ;;  %v41_v15 = vld [vmem:[%s827_s2 + $0x30] sm:$0xff]  ;;  %v34_v17 = vld [vmem:[%s826_s1 + $0x38] sm:$0xff]  ;;  %v232_v18 = vld [vmem:[%s828_s4] sm:$0xff] }
   0x7   :  { %562 = vmatprep.mubr.msk.f32.mxu0 %vm83_vm0, %v29_v4  ;;  %v233_v19 = vld [vmem:[%s828_s4 + $0x8] sm:$0xff]  ;;  %v234_v20 = vld [vmem:[%s828_s4 + $0x10] sm:$0xff]  ;;  %v235_v21 = vld [vmem:[%s828_s4 + $0x18] sm:$0xff] }
   0x8   :  { %50 = vperm.xlu0 %650, %v36_v7   ;;  %60 = vperm.xlu1 %651, %v38_v8   ;;  %v236_v22 = vld [vmem:[%s828_s4 + $0x20] sm:$0xff]  ;;  %v237_v23 = vld [vmem:[%s828_s4 + $0x28] sm:$0xff]  ;;  %v238_v24 = vld [vmem:[%s828_s4 + $0x30] sm:$0xff]  ;;  %v655_v7 = vmov 0.0|0.0   ;;  %v657_v8 = vmov 0.0  }
   0x9   :  { %v239_v25 = vld [vmem:[%s828_s4 + $0x38] sm:$0xff]  ;;  %v419_v26 = vld [vmem:[%s829_s6] sm:$0xf]  ;;  %v225_v0 = vld [vmem:[%s830_s3 + $0x8] sm:$0xff]  ;;  %634 = vmatprep.subr.bf16.mxu0 %v655_v7 }
   0xa   :  { %563 = vmatmul.mubr.msk.f32.gmra.mrb[2].mxu0 %vm83_vm0, %v30_v9  ;;  %v224_v27 = vld [vmem:[%s830_s3] sm:$0xff]  ;;  %v226_v1 = vld [vmem:[%s830_s3 + $0x10] sm:$0xff]  ;;  %v227_v2 = vld [vmem:[%s830_s3 + $0x18] sm:$0xff] }
   0xb   :  { %565 = vmatprep.mubr.msk.f32.mxu0 %vm83_vm0, %v31_v10  ;;  %587 = vmatprep.mubr.msk.f32.mxu1 %vm280_vm1, %v224_v27  ;;  %v228_v3 = vld [vmem:[%s830_s3 + $0x20] sm:$0xff]  ;;  %v229_v4 = vld [vmem:[%s830_s3 + $0x28] sm:$0xff]  ;;  %v230_v5 = vld [vmem:[%s830_s3 + $0x30] sm:$0xff] }
   0xc   :  { %65 = vperm.xlu0 %650, %v39_v11   ;;  %70 = vperm.xlu1 %651, %v40_v12   ;;  %v231_v6 = vld [vmem:[%s830_s3 + $0x38] sm:$0xff] }
   0xe   :  { %566 = vmatmul.mubr.msk.f32.gmra.mrb[4].mxu0 %vm83_vm0, %v32_v13 }
   0xf   :  { %568 = vmatprep.mubr.msk.f32.mxu0 %vm83_vm0, %v33_v14 }
  0x10   :  { %75 = vperm.xlu0 %650, %v41_v15   ;;  %80 = vperm.xlu1 %651, %v42_v16  }
  0x12   :  { %569 = vmatmul.mubr.msk.f32.gmra.mrb[6].mxu0 %vm83_vm0, %v34_v17 }
  0x13   :  { %615 = vmatprep.mubr.msk.f32.mxu0 %vm656_vm2, %v657_v8 }
  0x14   :  { %242 = vperm.xlu0 %650, %v232_v18   ;;  %247 = vperm.xlu1 %651, %v233_v19  }
  0x18   :  { %252 = vperm.xlu0 %650, %v234_v20   ;;  %257 = vperm.xlu1 %651, %v235_v21  }
  0x1c   :  { %262 = vperm.xlu0 %650, %v236_v22   ;;  %267 = vperm.xlu1 %651, %v237_v23  }
  0x20   :  { %272 = vperm.xlu0 %650, %v238_v24   ;;  %277 = vperm.xlu1 %651, %v239_v25  }
  0x24   :  { %422 = vperm.xlu0 %650, %v419_v26  }
  0x83   :  { %v46_v28 = vpop.permute.xlu0 %45  ;;  %v56_v29 = vpop.permute.xlu1 %55 }
  0x87   :  { %v51_v30 = vpop.permute.xlu0 %50  ;;  %v61_v31 = vpop.permute.xlu1 %60 }
  0x8b   :  { %v71_v41 = vpop.permute.xlu1 %70  ;;  %v66_v44 = vpop.permute.xlu0 %65 }
  0x8f   :  { %v81_v53 = vpop.permute.xlu1 %80  ;;  %v76_v56 = vpop.permute.xlu0 %75 }
  0x93   :  { %v248_v9 = vpop.permute.xlu1 %247  ;;  %v243_v10 = vpop.permute.xlu0 %242 }
  0x97   :  { %v258_v11 = vpop.permute.xlu1 %257  ;;  %v253_v13 = vpop.permute.xlu0 %252 }
  0x9b   :  { %v268_v22 = vpop.permute.xlu1 %267  ;;  %v263_v25 = vpop.permute.xlu0 %262 }
  0xd9   :  { %v561_v32 = vpop.f32.mrb[0].mxu0 }
  0xda   :  { %v183_v33 = vadd.f32 %v561_v32, %v51_v30  ;;  %v177_v34 = vpop.f32.mrb[1].mxu0 }
  0xdb   :  { %v178_v35 = vadd.f32 %v177_v34, %v46_v28  ;;  %v278_v34 = vpop.permute.xlu1 %277 }
  0xdc   :  { %v217_v36 = vmax.f32 %v183_v33, 0.0 }
  0xdd   :  { %v216_v37 = vmax.f32 %v178_v35, 0.0  ;;  %v564_v38 = vpop.f32.mrb[2].mxu0 }
  0xde   :  { %v193_v39 = vadd.f32 %v564_v38, %v61_v31  ;;  %v187_v40 = vpop.f32.mrb[3].mxu0 }
  0xdf   :  { %v188_v42 = vadd.f32 %v187_v40, %v56_v29  ;;  %v618_v43 = vpack.c.bf16 %v217_v36, %v216_v37  ;;  %v273_v37 = vpop.permute.xlu0 %272 }
  0xe0   :  { %v219_v45 = vmax.f32 %v193_v39, 0.0 }
  0xe1   :  { %v218_v46 = vmax.f32 %v188_v42, 0.0  ;;  %v567_v47 = vpop.f32.mrb[4].mxu0  ;;  %619 = vmatprep.subr.bf16.mxu1 %v618_v43 }
  0xe2   :  { %v203_v48 = vadd.f32 %v567_v47, %v71_v41  ;;  %v197_v49 = vpop.f32.mrb[5].mxu0  ;;  %621 = vmatpush3.bf16.msra.mxu1 %v618_v43 }
  0xe3   :  { %v622_v50 = vpack.c.bf16 %v219_v45, %v218_v46  ;;  %v198_v51 = vadd.f32 %v197_v49, %v66_v44  ;;  %v418_v45 = vld [vmem:[%s831_s5] sm:$0xf]  ;;  %v423_v46 = vpop.permute.xlu0 %422 }
  0xe4   :  { %v221_v52 = vmax.f32 %v203_v48, 0.0 }
  0xe5   :  { %v220_v54 = vmax.f32 %v198_v51, 0.0  ;;  %v570_v55 = vpop.f32.mrb[6].mxu0  ;;  %623 = vmatprep.subr.bf16.mxu1 %v622_v50 }
  0xe6   :  { %v213_v57 = vadd.f32 %v570_v55, %v81_v53  ;;  %v207_v58 = vpop.f32.mrb[7].mxu0  ;;  %625 = vmatpush3.bf16.msra.mxu1 %v622_v50 }
  0xe7   :  { %v626_v59 = vpack.c.bf16 %v221_v52, %v220_v54  ;;  %v208_v60 = vadd.f32 %v207_v58, %v76_v56 }
  0xe8   :  { %v223_v61 = vmax.f32 %v213_v57, 0.0 }
  0xe9   :  { %v222_v62 = vmax.f32 %v208_v60, 0.0  ;;  %627 = vmatprep.subr.bf16.mxu1 %v626_v59 }
  0xea   :  { %629 = vmatpush3.bf16.msra.mxu1 %v626_v59 }
  0xeb   :  { %v630_v63 = vpack.c.bf16 %v223_v61, %v222_v62 }
  0xed   :  { %631 = vmatprep.subr.bf16.mxu1 %v630_v63 }
  0xee   :  { %633 = vmatpush3.bf16.msra.mxu1 %v630_v63 }
  0xf1   :  { %588 = vmatmul.mubr.msk.f32.vlgmr.msra.gmra.mrb[0].mxu1 %vm280_vm1, %v225_v0 }
  0xf2   :  { %590 = vmatprep.mubr.msk.f32.mxu1 %vm280_vm1, %v226_v1 }
  0xf5   :  { %591 = vmatmul.mubr.msk.f32.gmra.mrb[2].mxu1 %vm280_vm1, %v227_v2 }
  0xf6   :  { %593 = vmatprep.mubr.msk.f32.mxu1 %vm280_vm1, %v228_v3 }
  0xf9   :  { %594 = vmatmul.mubr.msk.f32.gmra.mrb[4].mxu1 %vm280_vm1, %v229_v4 }
  0xfa   :  { %596 = vmatprep.mubr.msk.f32.mxu1 %vm280_vm1, %v230_v5 }
  0xfd   :  { %597 = vmatmul.mubr.msk.f32.gmra.mrb[6].mxu1 %vm280_vm1, %v231_v6 }
 0x1c4   :  { %v589_v12 = vpop.f32.mrb[0].mxu1 }
 0x1c5   :  { %v377_v14 = vadd.f32 %v589_v12, %v248_v9  ;;  %v371_v15 = vpop.f32.mrb[1].mxu1 }
 0x1c6   :  { %v372_v16 = vadd.f32 %v371_v15, %v243_v10 }
 0x1c7   :  { %v411_v17 = vmax.f32 %v377_v14, 0.0 }
 0x1c8   :  { %v410_v18 = vmax.f32 %v372_v16, 0.0  ;;  %v592_v19 = vpop.f32.mrb[2].mxu1 }
 0x1c9   :  { %v387_v20 = vadd.f32 %v592_v19, %v258_v11  ;;  %v381_v21 = vpop.f32.mrb[3].mxu1 }
 0x1ca   :  { %v635_v23 = vpack.c.bf16 %v411_v17, %v410_v18  ;;  %v382_v24 = vadd.f32 %v381_v21, %v253_v13 }
 0x1cb   :  { %v413_v26 = vmax.f32 %v387_v20, 0.0 }
 0x1cc   :  { %v412_v27 = vmax.f32 %v382_v24, 0.0  ;;  %v595_v28 = vpop.f32.mrb[4].mxu1  ;;  %636 = vmatpush3.bf16.msra.mxu0 %v635_v23 }
 0x1cd   :  { %v397_v29 = vadd.f32 %v595_v28, %v268_v22  ;;  %v391_v30 = vpop.f32.mrb[5].mxu1  ;;  %637 = vmatprep.subr.bf16.mxu0 %v655_v7 }
 0x1ce   :  { %v638_v31 = vpack.c.bf16 %v413_v26, %v412_v27  ;;  %v392_v32 = vadd.f32 %v391_v30, %v263_v25 }
 0x1cf   :  { %v415_v33 = vmax.f32 %v397_v29, 0.0 }
 0x1d0   :  { %v414_v35 = vmax.f32 %v392_v32, 0.0  ;;  %v598_v36 = vpop.f32.mrb[6].mxu1  ;;  %639 = vmatpush3.bf16.msra.mxu0 %v638_v31 }
 0x1d1   :  { %v407_v38 = vadd.f32 %v598_v36, %v278_v34  ;;  %v401_v39 = vpop.f32.mrb[7].mxu1  ;;  %640 = vmatprep.subr.bf16.mxu0 %v655_v7 }
 0x1d2   :  { %v641_v40 = vpack.c.bf16 %v415_v33, %v414_v35  ;;  %v402_v41 = vadd.f32 %v401_v39, %v273_v37 }
 0x1d3   :  { %v417_v42 = vmax.f32 %v407_v38, 0.0 }
 0x1d4   :  { %v416_v43 = vmax.f32 %v402_v41, 0.0  ;;  %642 = vmatpush3.bf16.msra.mxu0 %v641_v40 }
 0x1d5   :  { %643 = vmatprep.subr.bf16.mxu0 %v655_v7 }
 0x1d6   :  { %v644_v44 = vpack.c.bf16 %v417_v42, %v416_v43 }
 0x1d8   :  { %645 = vmatpush3.bf16.msra.mxu0 %v644_v44 }
 0x1db   :  { %616 = vmatmul.mubr.msk.f32.vlgmr.msra.gmra.mrb[8].mxu0 %vm280_vm1, %v418_v45 }
 0x2ae   :  { %v494_v47 = vpop.f32.mrb[8].mxu0 }
 0x2af   :  { %v495_v48 = vadd.f32 %v494_v47, %v423_v46  ;;  %v617_v49 = vpop.f32.mrb[9].mxu0 }
 0x2b1   :  { %652 = vtanh.f32 %v495_v48 }
 0x2bb   :  { %v653_v50 = vpop.eup %652 }
 0x2bc   :  { %500 = vst.msk [vmem:[%s832_s7] sm:$0xf] %vm499_vm3, %v653_v50 }

</bundles_post_ra>
